<compile_context>
chip_gen: v5e
topology: v5e:2x2
jax: 0.10.0
libtpu: 0.0.40
codegen_flags: <defaults>
</compile_context>

<pallas_src>
import jax
import jax.numpy as jnp
from jax import lax
from jax.experimental import pallas as pl
from jax.experimental.pallas import tpu as pltpu

# Stand-ins for the cfg.* constants referenced by the PyTorch module.
VAE_TARGET_KL = 3.0
VAE_MIN_BETA = 1e-4
VAE_MAX_BETA = 1.0

# Packed state/parameter layout (lane index inside the (1, PACK) f32 tile).
PACK = 16
_ERR, _INT, _TGT, _KP, _KI, _MOM, _MINB, _MAXB = range(8)


def _pic_kernel(values_ref, packed_ref, betas_ref, packed_out_ref):
    """Run `n` PI-controller steps in a single invocation.

    values_ref     : SMEM f32[n]         KL value per step.
    packed_ref     : VMEM f32[1, PACK]   [error, integral, target, k_p, k_i,
                                          momentum, min_beta, max_beta, pad...]
    betas_ref      : VMEM f32[1, n]      clamped beta per step.
    packed_out_ref : VMEM f32[1, PACK]   updated state (aliased with input).
    """
    n = betas_ref.shape[1]

    e0 = packed_ref[:, _ERR:_ERR + 1]
    i0 = packed_ref[:, _INT:_INT + 1]
    target = packed_ref[:, _TGT:_TGT + 1]
    k_p = packed_ref[:, _KP:_KP + 1]
    k_i = packed_ref[:, _KI:_KI + 1]
    mom = packed_ref[:, _MOM:_MOM + 1]
    min_b = packed_ref[:, _MINB:_MINB + 1]
    max_b = packed_ref[:, _MAXB:_MAXB + 1]

    lane = lax.broadcasted_iota(jnp.int32, (1, n), 1)

    def step(t, carry):
        e_prev, integ, betas = carry
        v = values_ref[t]                                   # SMEM scalar read
        e = (1.0 - mom) * e_prev + mom * (v - target)       # EMA of the error
        p = k_p / (1.0 + jnp.exp(-e))                       # k_p * sigmoid(e)
        i = integ + k_i * e
        y = jnp.clip(p + i, min_b, max_b)
        betas = jnp.where(lane == t, y, betas)              # insert beta_t
        return e, y - p, betas

    init = (e0, i0, jnp.zeros((1, n), jnp.float32))
    e_f, i_f, betas = lax.fori_loop(0, n, step, init, unroll=(n <= 32))

    betas_ref[...] = betas
    packed_out_ref[...] = packed_ref[...]      # hyper-parameters pass through
    packed_out_ref[:, _ERR:_ERR + 1] = e_f
    packed_out_ref[:, _INT:_INT + 1] = i_f


def pic_apply(values, packed):
    """One kernel launch running len(values) controller steps.

    Returns (betas[1, n], new_packed[1, PACK]).  `packed` is aliased in place.
    """
    n = values.shape[0]
    return pl.pallas_call(
        _pic_kernel,
        out_shape=(
            jax.ShapeDtypeStruct((1, n), jnp.float32),       # betas
            jax.ShapeDtypeStruct((1, PACK), jnp.float32),    # updated state
        ),
        in_specs=[
            pl.BlockSpec(memory_space=pltpu.MemorySpace.SMEM),   # values
            pl.BlockSpec((1, PACK), lambda: (0, 0)),             # packed state
        ],
        out_specs=(
            pl.BlockSpec((1, n), lambda: (0, 0)),
            pl.BlockSpec((1, PACK), lambda: (0, 0)),
        ),
        input_output_aliases={1: 1},   # update the state tile in place
    )(values, packed)


class PIC:
    """JAX/Pallas port of the PyTorch PIC module.

    State is threaded functionally through `pic_apply`; this class only
    mirrors the torch buffers for convenience.
    """

    def __init__(self, target=VAE_TARGET_KL, k_p=0.01, k_i=0.001, momentum=0.3,
                 min_beta=VAE_MIN_BETA, max_beta=VAE_MAX_BETA):
        packed = jnp.zeros((1, PACK), jnp.float32)       # error = integral = 0
        packed = packed.at[0, _TGT].set(target)
        packed = packed.at[0, _KP].set(k_p)
        packed = packed.at[0, _KI].set(k_i)
        packed = packed.at[0, _MOM].set(momentum)
        packed = packed.at[0, _MINB].set(min_beta)
        packed = packed.at[0, _MAXB].set(max_beta)
        self.packed = packed

    @property
    def error(self):
        return self.packed[0, _ERR]

    @property
    def integral(self):
        return self.packed[0, _INT]

    def forward(self, value):
        """Single controller step (matches the torch module's forward)."""
        values = jnp.asarray(value, jnp.float32).reshape(1)
        betas, self.packed = pic_apply(values, self.packed)
        return betas[0, 0]

    def forward_sequence(self, values):
        """Run many controller steps in a single kernel launch."""
        values = jnp.asarray(values, jnp.float32).reshape(-1)
        betas, self.packed = pic_apply(values, self.packed)
        return betas[0, :]


def _reference_sequence(values, *, target, k_p, k_i, momentum,
                        min_beta, max_beta):
    """Pure-JAX reference (starts from zero error/integral)."""
    error = jnp.float32(0.0)
    integral = jnp.float32(0.0)
    betas = []
    for idx in range(values.shape[0]):
        v = jnp.float32(values[idx])
        e = (1.0 - momentum) * error + momentum * (v - target)
        p = k_p / (1.0 + jnp.exp(-e))
        i = integral + k_i * e
        y = jnp.clip(p + i, min_beta, max_beta)
        error, integral = e, y - p
        betas.append(y)
    return jnp.stack(betas), error, integral


if __name__ == "__main__":
    key = jax.random.PRNGKey(0)
    n_steps = 8
    kl_values = jax.random.uniform(key, (n_steps,), minval=0.0, maxval=6.0,
                                   dtype=jnp.float32)

    # 1) Batched path: all controller steps in ONE kernel launch.
    pic_a = PIC()
    betas_a = pic_a.forward_sequence(kl_values)

    # 2) Step-by-step path with NON-default gains (params travel as data).
    custom = dict(target=2.0, k_p=0.05, k_i=0.002, momentum=0.5,
                  min_beta=VAE_MIN_BETA, max_beta=VAE_MAX_BETA)
    pic_b = PIC(**custom)
    betas_b = jnp.stack([pic_b.forward(kl_values[t]) for t in range(3)])

    # Block once at the end (no per-step host sync).
    jax.block_until_ready((betas_a, pic_a.packed, betas_b, pic_b.packed))

    # Pure-JAX references.
    ref_a, err_a, int_a = _reference_sequence(
        kl_values, target=VAE_TARGET_KL, k_p=0.01, k_i=0.001, momentum=0.3,
        min_beta=VAE_MIN_BETA, max_beta=VAE_MAX_BETA)
    ref_b, err_b, int_b = _reference_sequence(kl_values[:3], **custom)

    assert jnp.allclose(betas_a, ref_a, rtol=1e-5, atol=1e-6), (betas_a, ref_a)
    assert jnp.allclose(pic_a.error, err_a, rtol=1e-5, atol=1e-6)
    assert jnp.allclose(pic_a.integral, int_a, rtol=1e-5, atol=1e-6)

    assert jnp.allclose(betas_b, ref_b, rtol=1e-5, atol=1e-6), (betas_b, ref_b)
    assert jnp.allclose(pic_b.error, err_b, rtol=1e-5, atol=1e-6)
    assert jnp.allclose(pic_b.integral, int_b, rtol=1e-5, atol=1e-6)

    print("KERNEL_OK")
</pallas_src>

<mosaic_0001>
module attributes {stable_mosaic.version = 11 : i64} {
  func.func @_pic_kernel(%arg0: memref<8xf32, #tpu.memory_space<smem>>, %arg1: memref<1x16xf32, #tpu.memory_space<vmem>>, %arg2: memref<1x8xf32, #tpu.memory_space<vmem>>, %arg3: memref<1x16xf32, #tpu.memory_space<vmem>>) attributes {dimension_semantics = [], scalar_prefetch = 0 : i64, scratch_operands = 0 : i64, tpu.core_type = #tpu.core_type<tc>} {
    %c0 = arith.constant 0 : index
    %c0_0 = arith.constant 0 : index
    %0 = vector.load %arg1[%c0, %c0_0] : memref<1x16xf32, #tpu.memory_space<vmem>>, vector<1x1xf32>
    %c0_1 = arith.constant 0 : index
    %c1 = arith.constant 1 : index
    %1 = vector.load %arg1[%c0_1, %c1] : memref<1x16xf32, #tpu.memory_space<vmem>>, vector<1x1xf32>
    %c0_2 = arith.constant 0 : index
    %c2 = arith.constant 2 : index
    %2 = vector.load %arg1[%c0_2, %c2] : memref<1x16xf32, #tpu.memory_space<vmem>>, vector<1x1xf32>
    %c0_3 = arith.constant 0 : index
    %c3 = arith.constant 3 : index
    %3 = vector.load %arg1[%c0_3, %c3] : memref<1x16xf32, #tpu.memory_space<vmem>>, vector<1x1xf32>
    %c0_4 = arith.constant 0 : index
    %c4 = arith.constant 4 : index
    %4 = vector.load %arg1[%c0_4, %c4] : memref<1x16xf32, #tpu.memory_space<vmem>>, vector<1x1xf32>
    %c0_5 = arith.constant 0 : index
    %c5 = arith.constant 5 : index
    %5 = vector.load %arg1[%c0_5, %c5] : memref<1x16xf32, #tpu.memory_space<vmem>>, vector<1x1xf32>
    %c0_6 = arith.constant 0 : index
    %c6 = arith.constant 6 : index
    %6 = vector.load %arg1[%c0_6, %c6] : memref<1x16xf32, #tpu.memory_space<vmem>>, vector<1x1xf32>
    %c0_7 = arith.constant 0 : index
    %c7 = arith.constant 7 : index
    %7 = vector.load %arg1[%c0_7, %c7] : memref<1x16xf32, #tpu.memory_space<vmem>>, vector<1x1xf32>
    %8 = tpu.iota {dimensions = array<i32: 1>} : vector<1x8xi32>
    %cst = arith.constant 0.000000e+00 : f32
    %9 = vector.broadcast %cst : f32 to vector<1x8xf32>
    %c0_i32 = arith.constant 0 : i32
    %10 = arith.index_cast %c0_i32 : i32 to index
    %11 = memref.load %arg0[%10] : memref<8xf32, #tpu.memory_space<smem>>
    %cst_8 = arith.constant 1.000000e+00 : f32
    %12 = vector.broadcast %cst_8 : f32 to vector<1x1xf32>
    %13 = arith.subf %12, %5 : vector<1x1xf32>
    %14 = arith.mulf %13, %0 : vector<1x1xf32>
    %15 = vector.broadcast %11 : f32 to vector<1x1xf32>
    %16 = arith.subf %15, %2 : vector<1x1xf32>
    %17 = arith.mulf %5, %16 : vector<1x1xf32>
    %18 = arith.addf %14, %17 : vector<1x1xf32>
    %cst_9 = arith.constant 0.000000e+00 : f32
    %19 = vector.broadcast %cst_9 : f32 to vector<1x1xf32>
    %20 = arith.subf %19, %18 : vector<1x1xf32>
    %21 = math.exp %20 : vector<1x1xf32>
    %cst_10 = arith.constant 1.000000e+00 : f32
    %22 = vector.broadcast %cst_10 : f32 to vector<1x1xf32>
    %23 = arith.addf %22, %21 : vector<1x1xf32>
    %24 = arith.divf %3, %23 : vector<1x1xf32>
    %25 = arith.mulf %4, %18 : vector<1x1xf32>
    %26 = arith.addf %1, %25 : vector<1x1xf32>
    %27 = arith.addf %24, %26 : vector<1x1xf32>
    %28 = arith.maximumf %6, %27 : vector<1x1xf32>
    %29 = arith.minimumf %7, %28 : vector<1x1xf32>
    %30 = vector.broadcast %c0_i32 : i32 to vector<1x8xi32>
    %31 = arith.cmpi eq, %8, %30 : vector<1x8xi32>
    %32 = vector.shape_cast %29 : vector<1x1xf32> to vector<1x1xf32>
    %33 = vector.broadcast %32 : vector<1x1xf32> to vector<1x8xf32>
    %34 = arith.select %31, %33, %9 : vector<1x8xi1>, vector<1x8xf32>
    %35 = arith.subf %29, %24 : vector<1x1xf32>
    %c1_i32 = arith.constant 1 : i32
    %36 = arith.index_cast %c1_i32 : i32 to index
    %37 = memref.load %arg0[%36] : memref<8xf32, #tpu.memory_space<smem>>
    %cst_11 = arith.constant 1.000000e+00 : f32
    %38 = vector.broadcast %cst_11 : f32 to vector<1x1xf32>
    %39 = arith.subf %38, %5 : vector<1x1xf32>
    %40 = arith.mulf %39, %18 : vector<1x1xf32>
    %41 = vector.broadcast %37 : f32 to vector<1x1xf32>
    %42 = arith.subf %41, %2 : vector<1x1xf32>
    %43 = arith.mulf %5, %42 : vector<1x1xf32>
    %44 = arith.addf %40, %43 : vector<1x1xf32>
    %cst_12 = arith.constant 0.000000e+00 : f32
    %45 = vector.broadcast %cst_12 : f32 to vector<1x1xf32>
    %46 = arith.subf %45, %44 : vector<1x1xf32>
    %47 = math.exp %46 : vector<1x1xf32>
    %cst_13 = arith.constant 1.000000e+00 : f32
    %48 = vector.broadcast %cst_13 : f32 to vector<1x1xf32>
    %49 = arith.addf %48, %47 : vector<1x1xf32>
    %50 = arith.divf %3, %49 : vector<1x1xf32>
    %51 = arith.mulf %4, %44 : vector<1x1xf32>
    %52 = arith.addf %35, %51 : vector<1x1xf32>
    %53 = arith.addf %50, %52 : vector<1x1xf32>
    %54 = arith.maximumf %6, %53 : vector<1x1xf32>
    %55 = arith.minimumf %7, %54 : vector<1x1xf32>
    %56 = vector.broadcast %c1_i32 : i32 to vector<1x8xi32>
    %57 = arith.cmpi eq, %8, %56 : vector<1x8xi32>
    %58 = vector.shape_cast %55 : vector<1x1xf32> to vector<1x1xf32>
    %59 = vector.broadcast %58 : vector<1x1xf32> to vector<1x8xf32>
    %60 = arith.select %57, %59, %34 : vector<1x8xi1>, vector<1x8xf32>
    %61 = arith.subf %55, %50 : vector<1x1xf32>
    %c2_i32 = arith.constant 2 : i32
    %62 = arith.index_cast %c2_i32 : i32 to index
    %63 = memref.load %arg0[%62] : memref<8xf32, #tpu.memory_space<smem>>
    %cst_14 = arith.constant 1.000000e+00 : f32
    %64 = vector.broadcast %cst_14 : f32 to vector<1x1xf32>
    %65 = arith.subf %64, %5 : vector<1x1xf32>
    %66 = arith.mulf %65, %44 : vector<1x1xf32>
    %67 = vector.broadcast %63 : f32 to vector<1x1xf32>
    %68 = arith.subf %67, %2 : vector<1x1xf32>
    %69 = arith.mulf %5, %68 : vector<1x1xf32>
    %70 = arith.addf %66, %69 : vector<1x1xf32>
    %cst_15 = arith.constant 0.000000e+00 : f32
    %71 = vector.broadcast %cst_15 : f32 to vector<1x1xf32>
    %72 = arith.subf %71, %70 : vector<1x1xf32>
    %73 = math.exp %72 : vector<1x1xf32>
    %cst_16 = arith.constant 1.000000e+00 : f32
    %74 = vector.broadcast %cst_16 : f32 to vector<1x1xf32>
    %75 = arith.addf %74, %73 : vector<1x1xf32>
    %76 = arith.divf %3, %75 : vector<1x1xf32>
    %77 = arith.mulf %4, %70 : vector<1x1xf32>
    %78 = arith.addf %61, %77 : vector<1x1xf32>
    %79 = arith.addf %76, %78 : vector<1x1xf32>
    %80 = arith.maximumf %6, %79 : vector<1x1xf32>
    %81 = arith.minimumf %7, %80 : vector<1x1xf32>
    %82 = vector.broadcast %c2_i32 : i32 to vector<1x8xi32>
    %83 = arith.cmpi eq, %8, %82 : vector<1x8xi32>
    %84 = vector.shape_cast %81 : vector<1x1xf32> to vector<1x1xf32>
    %85 = vector.broadcast %84 : vector<1x1xf32> to vector<1x8xf32>
    %86 = arith.select %83, %85, %60 : vector<1x8xi1>, vector<1x8xf32>
    %87 = arith.subf %81, %76 : vector<1x1xf32>
    %c3_i32 = arith.constant 3 : i32
    %88 = arith.index_cast %c3_i32 : i32 to index
    %89 = memref.load %arg0[%88] : memref<8xf32, #tpu.memory_space<smem>>
    %cst_17 = arith.constant 1.000000e+00 : f32
    %90 = vector.broadcast %cst_17 : f32 to vector<1x1xf32>
    %91 = arith.subf %90, %5 : vector<1x1xf32>
    %92 = arith.mulf %91, %70 : vector<1x1xf32>
    %93 = vector.broadcast %89 : f32 to vector<1x1xf32>
    %94 = arith.subf %93, %2 : vector<1x1xf32>
    %95 = arith.mulf %5, %94 : vector<1x1xf32>
    %96 = arith.addf %92, %95 : vector<1x1xf32>
    %cst_18 = arith.constant 0.000000e+00 : f32
    %97 = vector.broadcast %cst_18 : f32 to vector<1x1xf32>
    %98 = arith.subf %97, %96 : vector<1x1xf32>
    %99 = math.exp %98 : vector<1x1xf32>
    %cst_19 = arith.constant 1.000000e+00 : f32
    %100 = vector.broadcast %cst_19 : f32 to vector<1x1xf32>
    %101 = arith.addf %100, %99 : vector<1x1xf32>
    %102 = arith.divf %3, %101 : vector<1x1xf32>
    %103 = arith.mulf %4, %96 : vector<1x1xf32>
    %104 = arith.addf %87, %103 : vector<1x1xf32>
    %105 = arith.addf %102, %104 : vector<1x1xf32>
    %106 = arith.maximumf %6, %105 : vector<1x1xf32>
    %107 = arith.minimumf %7, %106 : vector<1x1xf32>
    %108 = vector.broadcast %c3_i32 : i32 to vector<1x8xi32>
    %109 = arith.cmpi eq, %8, %108 : vector<1x8xi32>
    %110 = vector.shape_cast %107 : vector<1x1xf32> to vector<1x1xf32>
    %111 = vector.broadcast %110 : vector<1x1xf32> to vector<1x8xf32>
    %112 = arith.select %109, %111, %86 : vector<1x8xi1>, vector<1x8xf32>
    %113 = arith.subf %107, %102 : vector<1x1xf32>
    %c4_i32 = arith.constant 4 : i32
    %114 = arith.index_cast %c4_i32 : i32 to index
    %115 = memref.load %arg0[%114] : memref<8xf32, #tpu.memory_space<smem>>
    %cst_20 = arith.constant 1.000000e+00 : f32
    %116 = vector.broadcast %cst_20 : f32 to vector<1x1xf32>
    %117 = arith.subf %116, %5 : vector<1x1xf32>
    %118 = arith.mulf %117, %96 : vector<1x1xf32>
    %119 = vector.broadcast %115 : f32 to vector<1x1xf32>
    %120 = arith.subf %119, %2 : vector<1x1xf32>
    %121 = arith.mulf %5, %120 : vector<1x1xf32>
    %122 = arith.addf %118, %121 : vector<1x1xf32>
    %cst_21 = arith.constant 0.000000e+00 : f32
    %123 = vector.broadcast %cst_21 : f32 to vector<1x1xf32>
    %124 = arith.subf %123, %122 : vector<1x1xf32>
    %125 = math.exp %124 : vector<1x1xf32>
    %cst_22 = arith.constant 1.000000e+00 : f32
    %126 = vector.broadcast %cst_22 : f32 to vector<1x1xf32>
    %127 = arith.addf %126, %125 : vector<1x1xf32>
    %128 = arith.divf %3, %127 : vector<1x1xf32>
    %129 = arith.mulf %4, %122 : vector<1x1xf32>
    %130 = arith.addf %113, %129 : vector<1x1xf32>
    %131 = arith.addf %128, %130 : vector<1x1xf32>
    %132 = arith.maximumf %6, %131 : vector<1x1xf32>
    %133 = arith.minimumf %7, %132 : vector<1x1xf32>
    %134 = vector.broadcast %c4_i32 : i32 to vector<1x8xi32>
    %135 = arith.cmpi eq, %8, %134 : vector<1x8xi32>
    %136 = vector.shape_cast %133 : vector<1x1xf32> to vector<1x1xf32>
    %137 = vector.broadcast %136 : vector<1x1xf32> to vector<1x8xf32>
    %138 = arith.select %135, %137, %112 : vector<1x8xi1>, vector<1x8xf32>
    %139 = arith.subf %133, %128 : vector<1x1xf32>
    %c5_i32 = arith.constant 5 : i32
    %140 = arith.index_cast %c5_i32 : i32 to index
    %141 = memref.load %arg0[%140] : memref<8xf32, #tpu.memory_space<smem>>
    %cst_23 = arith.constant 1.000000e+00 : f32
    %142 = vector.broadcast %cst_23 : f32 to vector<1x1xf32>
    %143 = arith.subf %142, %5 : vector<1x1xf32>
    %144 = arith.mulf %143, %122 : vector<1x1xf32>
    %145 = vector.broadcast %141 : f32 to vector<1x1xf32>
    %146 = arith.subf %145, %2 : vector<1x1xf32>
    %147 = arith.mulf %5, %146 : vector<1x1xf32>
    %148 = arith.addf %144, %147 : vector<1x1xf32>
    %cst_24 = arith.constant 0.000000e+00 : f32
    %149 = vector.broadcast %cst_24 : f32 to vector<1x1xf32>
    %150 = arith.subf %149, %148 : vector<1x1xf32>
    %151 = math.exp %150 : vector<1x1xf32>
    %cst_25 = arith.constant 1.000000e+00 : f32
    %152 = vector.broadcast %cst_25 : f32 to vector<1x1xf32>
    %153 = arith.addf %152, %151 : vector<1x1xf32>
    %154 = arith.divf %3, %153 : vector<1x1xf32>
    %155 = arith.mulf %4, %148 : vector<1x1xf32>
    %156 = arith.addf %139, %155 : vector<1x1xf32>
    %157 = arith.addf %154, %156 : vector<1x1xf32>
    %158 = arith.maximumf %6, %157 : vector<1x1xf32>
    %159 = arith.minimumf %7, %158 : vector<1x1xf32>
    %160 = vector.broadcast %c5_i32 : i32 to vector<1x8xi32>
    %161 = arith.cmpi eq, %8, %160 : vector<1x8xi32>
    %162 = vector.shape_cast %159 : vector<1x1xf32> to vector<1x1xf32>
    %163 = vector.broadcast %162 : vector<1x1xf32> to vector<1x8xf32>
    %164 = arith.select %161, %163, %138 : vector<1x8xi1>, vector<1x8xf32>
    %165 = arith.subf %159, %154 : vector<1x1xf32>
    %c6_i32 = arith.constant 6 : i32
    %166 = arith.index_cast %c6_i32 : i32 to index
    %167 = memref.load %arg0[%166] : memref<8xf32, #tpu.memory_space<smem>>
    %cst_26 = arith.constant 1.000000e+00 : f32
    %168 = vector.broadcast %cst_26 : f32 to vector<1x1xf32>
    %169 = arith.subf %168, %5 : vector<1x1xf32>
    %170 = arith.mulf %169, %148 : vector<1x1xf32>
    %171 = vector.broadcast %167 : f32 to vector<1x1xf32>
    %172 = arith.subf %171, %2 : vector<1x1xf32>
    %173 = arith.mulf %5, %172 : vector<1x1xf32>
    %174 = arith.addf %170, %173 : vector<1x1xf32>
    %cst_27 = arith.constant 0.000000e+00 : f32
    %175 = vector.broadcast %cst_27 : f32 to vector<1x1xf32>
    %176 = arith.subf %175, %174 : vector<1x1xf32>
    %177 = math.exp %176 : vector<1x1xf32>
    %cst_28 = arith.constant 1.000000e+00 : f32
    %178 = vector.broadcast %cst_28 : f32 to vector<1x1xf32>
    %179 = arith.addf %178, %177 : vector<1x1xf32>
    %180 = arith.divf %3, %179 : vector<1x1xf32>
    %181 = arith.mulf %4, %174 : vector<1x1xf32>
    %182 = arith.addf %165, %181 : vector<1x1xf32>
    %183 = arith.addf %180, %182 : vector<1x1xf32>
    %184 = arith.maximumf %6, %183 : vector<1x1xf32>
    %185 = arith.minimumf %7, %184 : vector<1x1xf32>
    %186 = vector.broadcast %c6_i32 : i32 to vector<1x8xi32>
    %187 = arith.cmpi eq, %8, %186 : vector<1x8xi32>
    %188 = vector.shape_cast %185 : vector<1x1xf32> to vector<1x1xf32>
    %189 = vector.broadcast %188 : vector<1x1xf32> to vector<1x8xf32>
    %190 = arith.select %187, %189, %164 : vector<1x8xi1>, vector<1x8xf32>
    %191 = arith.subf %185, %180 : vector<1x1xf32>
    %c7_i32 = arith.constant 7 : i32
    %192 = arith.index_cast %c7_i32 : i32 to index
    %193 = memref.load %arg0[%192] : memref<8xf32, #tpu.memory_space<smem>>
    %cst_29 = arith.constant 1.000000e+00 : f32
    %194 = vector.broadcast %cst_29 : f32 to vector<1x1xf32>
    %195 = arith.subf %194, %5 : vector<1x1xf32>
    %196 = arith.mulf %195, %174 : vector<1x1xf32>
    %197 = vector.broadcast %193 : f32 to vector<1x1xf32>
    %198 = arith.subf %197, %2 : vector<1x1xf32>
    %199 = arith.mulf %5, %198 : vector<1x1xf32>
    %200 = arith.addf %196, %199 : vector<1x1xf32>
    %cst_30 = arith.constant 0.000000e+00 : f32
    %201 = vector.broadcast %cst_30 : f32 to vector<1x1xf32>
    %202 = arith.subf %201, %200 : vector<1x1xf32>
    %203 = math.exp %202 : vector<1x1xf32>
    %cst_31 = arith.constant 1.000000e+00 : f32
    %204 = vector.broadcast %cst_31 : f32 to vector<1x1xf32>
    %205 = arith.addf %204, %203 : vector<1x1xf32>
    %206 = arith.divf %3, %205 : vector<1x1xf32>
    %207 = arith.mulf %4, %200 : vector<1x1xf32>
    %208 = arith.addf %191, %207 : vector<1x1xf32>
    %209 = arith.addf %206, %208 : vector<1x1xf32>
    %210 = arith.maximumf %6, %209 : vector<1x1xf32>
    %211 = arith.minimumf %7, %210 : vector<1x1xf32>
    %212 = vector.broadcast %c7_i32 : i32 to vector<1x8xi32>
    %213 = arith.cmpi eq, %8, %212 : vector<1x8xi32>
    %214 = vector.shape_cast %211 : vector<1x1xf32> to vector<1x1xf32>
    %215 = vector.broadcast %214 : vector<1x1xf32> to vector<1x8xf32>
    %216 = arith.select %213, %215, %190 : vector<1x8xi1>, vector<1x8xf32>
    %217 = arith.subf %211, %206 : vector<1x1xf32>
    %c8_i32 = arith.constant 8 : i32
    %c0_32 = arith.constant 0 : index
    %c0_33 = arith.constant 0 : index
    %218 = vector.load %arg2[%c0_32, %c0_33] : memref<1x8xf32, #tpu.memory_space<vmem>>, vector<1x8xf32>
    tpu.vector_store %arg2[%c0_32, %c0_33], %216 {strides = array<i32>} : memref<1x8xf32, #tpu.memory_space<vmem>>, vector<1x8xf32>,
    %c0_34 = arith.constant 0 : index
    %c0_35 = arith.constant 0 : index
    %219 = vector.load %arg1[%c0_34, %c0_35] : memref<1x16xf32, #tpu.memory_space<vmem>>, vector<1x16xf32>
    %c0_36 = arith.constant 0 : index
    %c0_37 = arith.constant 0 : index
    %220 = vector.load %arg3[%c0_36, %c0_37] : memref<1x16xf32, #tpu.memory_space<vmem>>, vector<1x16xf32>
    tpu.vector_store %arg3[%c0_36, %c0_37], %219 {strides = array<i32>} : memref<1x16xf32, #tpu.memory_space<vmem>>, vector<1x16xf32>,
    %c0_38 = arith.constant 0 : index
    %c0_39 = arith.constant 0 : index
    %221 = vector.load %arg3[%c0_38, %c0_39] : memref<1x16xf32, #tpu.memory_space<vmem>>, vector<1x1xf32>
    tpu.vector_store %arg3[%c0_38, %c0_39], %200 {strides = array<i32>} : memref<1x16xf32, #tpu.memory_space<vmem>>, vector<1x1xf32>,
    %c0_40 = arith.constant 0 : index
    %c1_41 = arith.constant 1 : index
    %222 = vector.load %arg3[%c0_40, %c1_41] : memref<1x16xf32, #tpu.memory_space<vmem>>, vector<1x1xf32>
    tpu.vector_store %arg3[%c0_40, %c1_41], %217 {strides = array<i32>} : memref<1x16xf32, #tpu.memory_space<vmem>>, vector<1x1xf32>,
    return
  }
}

</mosaic_0001>

<bundles_post_ra>
// kernel: tpu_custom_call.1
= control target key start
LH: loop header
LB: loop body
LE: loop exit
PB: predicated region body
PF: predicated region fallthrough
CT: control target
= control target key end

     0   :  { %9 = vsyncpa [#allocation5], 0  ;;  %s1022_s0 = inlined_call_operand.vmem [shape: f32[8], index: 0, kind: input, shape index: {}]   ;;  %s1023_s1 = inlined_call_operand.hbm [shape: f32[1,16], index: 1, kind: input, shape index: {}, may-alias: {1,3}]   ;;  %s1024_s2 = inlined_call_operand.hbm [shape: f32[1,8], index: 2, kind: output, shape index: {0}]   ;;  %s1025_s3 = inlined_call_operand.hbm [shape: f32[1,16], index: 3, kind: output, shape index: {1}, may-alias: {1,3}]  }
   0x1   :  { %10 = vsyncpa [#allocation3], 0 }
   0x2   :  { %11 = vsyncpa [#allocation4], 0 }
   0x3   :  { %12 = vsyncpa [#allocation9], 0  ;;  %s18_s14 = sshll.u32 %s1022_s0, 4  ;;  %s27_s17 = sshll.u32 %s1023_s1, 4  ;;  %s19_s14 = int_to_ptr.vmem [resolvable:$true] %s18_s14  ;;  %s28_s17 = int_to_ptr.hbm [resolvable:$true] %s27_s17 }
   0x4   :  { %s820_s18 = smov [#allocation2]   ;;  %s821_s19 = smov [#allocation6]  }
   0x5   :  { %21 = dma.vmem_to_smem %s19_s14, 16, %s820_s18, [#allocation5]  }
   0x6   :  { %s29_s20 = sshll.u32 %s821_s19, 4  ;;  %s30_s20 = int_to_ptr.vmem [resolvable:$true] %s29_s20 }
   0x7   :  { %32 = dma.hbm_to_vmem [thread:$0]  %s28_s17, 16, %s30_s20, [#allocation3]  }
   0x8   :  { %812 = dma.done.wait [#allocation5], 16  }
   0x9   :  { %813 = vsyncadd [#allocation5], 4294967280 }
   0xa   :  { %814 = dma.done.wait [#allocation3], 16  }
   0xb   :  { %815 = vsyncadd [#allocation3], 4294967280 }
   0xc   :  { %41 = sfence }
   0xd   :  { %v862_v0 = vld [vmem:[#allocation6] sm:$0x1]  ;;  %s45_s0 = sld [smem:[#allocation2]]  ;;  %s822_s21 = smov 5  }
   0xe   :  { %48 = vrot.lane.b32.xlu0 %v862_v0, %s822_s21  ;;  %s670_s22 = sld [smem:[#allocation2 + $0x1]]  ;;  %s823_s1 = smov 3   ;;  %v870_v6 = vsub.f32 1.0, %v862_v0 }
   0xf   :  { %s824_s23 = smov 127   ;;  %s825_s24 = smov 126  }
  0x10   :  { %s826_s25 = smov 125   ;;  %s827_s26 = smov 2  }
  0x11   :  { %s671_s27 = sld [smem:[#allocation2 + $0x2]]  ;;  %s828_s28 = smov 4  }
  0x12   :  { %s829_s29 = smov 1   ;;  %s830_s30 = smov 124  }
  0x13   :  { %v52_v1 = vstv %s45_s0  ;;  %s672_s4 = sld [smem:[#allocation2 + $0x3]]  ;;  %s832_s9 = smov 123  }
  0x14   :  { %v53_v2 = vsub.f32 %v52_v1, %v862_v0  ;;  %v123_v3 = vstv %s670_s22  ;;  %s673_s5 = sld [smem:[#allocation2 + $0x4]]  ;;  %s833_s10 = smov 122  }
  0x15   :  { %v124_v4 = vsub.f32 %v123_v3, %v862_v0  ;;  %s674_s6 = sld [smem:[#allocation2 + $0x5]]  ;;  %s834_s11 = smov [#allocation7]  }
  0x16   :  { %55 = vrot.lane.b32.xlu0 %v53_v2, %s823_s1  ;;  %s675_s7 = sld [smem:[#allocation2 + $0x6]]  ;;  %s641_s12 = sshll.u32 %s834_s11, 4  ;;  %s642_s12 = int_to_ptr.vmem [resolvable:$true] %s641_s12 }
  0x17   :  { %v194_v39 = vstv %s671_s27  ;;  %s676_s8 = sld [smem:[#allocation2 + $0x7]]  ;;  %s643_s15 = sshll.u32 %s1024_s2, 4  ;;  %s644_s15 = int_to_ptr.hbm [resolvable:$true] %s643_s15 }
  0x18   :  { %v195_v40 = vsub.f32 %v194_v39, %v862_v0  ;;  %s835_s16 = smov [#allocation8]   ;;  %s654_s20 = sshll.u32 %s1025_s3, 4  ;;  %s655_s20 = int_to_ptr.hbm [resolvable:$true] %s654_s20 }
  0x19   :  { %s652_s17 = sshll.u32 %s835_s16, 4  ;;  %s653_s17 = int_to_ptr.vmem [resolvable:$true] %s652_s17 }
  0x1e   :  { %126 = vrot.lane.b32.xlu0 %v124_v4, %s823_s1 }
  0x80   :  { %v49_v5 = vpop.permute.xlu0 %48 }
  0x81   :  { %v51_v8 = vmul.f32 %v49_v5, %v870_v6 }
  0x88   :  { %v56_v7 = vpop.permute.xlu0 %55 }
  0x89   :  { %v58_v9 = vmul.f32 %v56_v7, %v862_v0 }
  0x8b   :  { %v59_v10 = vadd.f32 %v58_v9, %v51_v8 }
  0x8d   :  { %84 = vrot.lane.b32.xlu1 %v59_v10, %s824_s23  ;;  %v60_v11 = vsub.f32 0.0, %v59_v10  ;;  %v122_v21 = vmul.f32 %v59_v10, %v870_v6 }
  0x8f   :  { %v61_v12 = vmul.f32 1.442695, %v60_v11  ;;  %v265_v11 = vstv %s672_s4 }
  0x90   :  { %v127_v19 = vpop.permute.xlu0 %126 }
  0x91   :  { %696 = vpow2.f32 %v61_v12  ;;  %v129_v20 = vmul.f32 %v127_v19, %v862_v0  ;;  %v266_v12 = vsub.f32 %v265_v11, %v862_v0 }
  0x93   :  { %v130_v22 = vadd.f32 %v129_v20, %v122_v21 }
  0x95   :  { %v131_v41 = vsub.f32 0.0, %v130_v22  ;;  %v193_v55 = vmul.f32 %v130_v22, %v870_v6 }
  0x97   :  { %v697_v13 = vpop.eup %696  ;;  %v132_v42 = vmul.f32 1.442695, %v131_v41 }
  0x98   :  { %v63_v14 = vadd.f32 1.0, %v697_v13 }
  0x9a   :  { %65 = vrot.lane.b32.xlu2 %v63_v14, %s825_s24 }
  0xf4   :  { %v66_v23 = vpop.permute.xlu2 %65 }
  0xf5   :  { %698 = vrcp.f32 %v66_v23  ;;  %v79_v29 = vand.u32 2147483648, %v66_v23  ;;  %vm73_vm1 = vweird.f32 %v66_v23  ;;  %v77_v30 = vand.u32 2147483647, %v66_v23 }
  0xf6   :  { %700 = vpow2.f32 %v132_v42 }
  0xf7   :  { %v80_v32 = vor.u32 1.1754944e-38, %v79_v29  ;;  %vm78_vm3 = vcmp.eq.f32.partialorder %v77_v30, 8.507059e+37 }
  0xfb   :  { %v699_v24 = vpop.eup %698 }
  0xfc   :  { %v69_v25 = vmul.f32 %v699_v24, %v66_v23  ;;  %vm74_vm0 = vweird.f32 %v699_v24  ;;  %v701_v45 = vpop.eup %700 }
  0xfd   :  { %vm75_vm2 = vmor %vm73_vm1, %vm74_vm0  ;;  %v134_v46 = vadd.f32 1.0, %v701_v45  ;;  %v336_v45 = vstv %s673_s5 }
  0xfe   :  { %v70_v26 = vsub.f32 1.0, %v69_v25 }
  0xff   :  { %v85_v15 = vpop.permute.xlu1 %84 }
 0x100   :  { %v87_v16 = vmul.f32 %v85_v15, %v862_v0  ;;  %v71_v27 = vmul.f32 %v699_v24, %v70_v26 }
 0x102   :  { %89 = vrot.lane.b32.xlu1 %v87_v16, %s826_s25  ;;  %v72_v28 = vadd.f32 %v699_v24, %v71_v27 }
 0x104   :  { %v76_v31 = vsel %vm75_vm2, %v699_v24, %v72_v28 }
 0x105   :  { %v81_v33 = vsel %vm78_vm3, %v80_v32, %v76_v31 }
 0x106   :  { %v82_v34 = vmul.f32 %v81_v33, %v862_v0 }
 0x174   :  { %v90_v17 = vpop.permute.xlu1 %89 }
 0x175   :  { %v92_v18 = vadd.f32 %v90_v17, %v862_v0 }
 0x177   :  { %94 = vrot.lane.b32.xlu2 %v92_v18, %s827_s26 }
 0x17f   :  { %155 = vrot.lane.b32.xlu2 %v130_v22, %s824_s23 }
 0x1d1   :  { %v95_v35 = vpop.permute.xlu2 %94 }
 0x1d2   :  { %v97_v36 = vadd.f32 %v95_v35, %v82_v34 }
 0x1d4   :  { %99 = vrot.lane.b32.xlu1 %v97_v36, %s823_s1 }
 0x1d9   :  { %v156_v37 = vpop.permute.xlu2 %155 }
 0x1da   :  { %v158_v38 = vmul.f32 %v156_v37, %v862_v0 }
 0x1dc   :  { %117 = vrot.lane.b32.xlu1 %v82_v34, %s828_s28  ;;  %160 = vrot.lane.b32.xlu2 %v158_v38, %s823_s1 }
 0x1e4   :  { %197 = vrot.lane.b32.xlu2 %v195_v40, %s823_s1 }
 0x236   :  { %v161_v47 = vpop.permute.xlu2 %160 }
 0x23e   :  { %v198_v53 = vpop.permute.xlu2 %197 }
 0x23f   :  { %v200_v54 = vmul.f32 %v198_v53, %v862_v0 }
 0x241   :  { %v201_v56 = vadd.f32 %v200_v54, %v193_v55 }
 0x243   :  { %v202_v13 = vsub.f32 0.0, %v201_v56  ;;  %v264_v27 = vmul.f32 %v201_v56, %v870_v6 }
 0x245   :  { %v203_v14 = vmul.f32 1.442695, %v202_v13 }
 0x246   :  { %v100_v43 = vpop.permute.xlu1 %99 }
 0x247   :  { %v102_v44 = vmax.f32 %v862_v0, %v100_v43 }
 0x249   :  { %104 = vrot.lane.b32.xlu0 %v102_v44, %s829_s29 }
 0x24e   :  { %v118_v50 = vpop.permute.xlu1 %117 }
 0x251   :  { %136 = vrot.lane.b32.xlu0 %v134_v46, %s825_s24  ;;  %v337_v46 = vsub.f32 %v336_v45, %v862_v0 }
 0x2bb   :  { %v105_v48 = vpop.permute.xlu0 %104 }
 0x2bc   :  { %v892_v49 = vmin.f32 %v862_v0, %v105_v48 }
 0x2be   :  { %v120_v51 = vsub.f32 %v892_v49, %v118_v50 }
 0x2c0   :  { %v163_v52 = vadd.f32 %v161_v47, %v120_v51 }
 0x2c2   :  { %165 = vrot.lane.b32.xlu1 %v163_v52, %s830_s30 }
 0x2c3   :  { %v137_v57 = vpop.permute.xlu0 %136 }
 0x2c4   :  { %702 = vrcp.f32 %v137_v57  ;;  %v150_v63 = vand.u32 2147483648, %v137_v57  ;;  %vm144_vm5 = vweird.f32 %v137_v57  ;;  %v148_v1 = vand.u32 2147483647, %v137_v57 }
 0x2c5   :  { %704 = vpow2.f32 %v203_v14 }
 0x2c6   :  { %v151_v3 = vor.u32 1.1754944e-38, %v150_v63  ;;  %vm149_vm7 = vcmp.eq.f32.partialorder %v148_v1, 8.507059e+37 }
 0x2ca   :  { %226 = vrot.lane.b32.xlu1 %v201_v56, %s824_s23  ;;  %v703_v58 = vpop.eup %702 }
 0x2cb   :  { %v140_v59 = vmul.f32 %v703_v58, %v137_v57  ;;  %vm145_vm4 = vweird.f32 %v703_v58  ;;  %v705_v17 = vpop.eup %704 }
 0x2cc   :  { %vm146_vm6 = vmor %vm144_vm5, %vm145_vm4  ;;  %v205_v18 = vadd.f32 1.0, %v705_v17 }
 0x2cd   :  { %v141_v60 = vsub.f32 1.0, %v140_v59 }
 0x2cf   :  { %v142_v61 = vmul.f32 %v703_v58, %v141_v60 }
 0x2d1   :  { %v143_v62 = vadd.f32 %v703_v58, %v142_v61 }
 0x2d3   :  { %v147_v2 = vsel %vm146_vm6, %v703_v58, %v143_v62 }
 0x2d4   :  { %v152_v4 = vsel %vm149_vm7, %v151_v3, %v147_v2 }
 0x2d5   :  { %v153_v5 = vmul.f32 %v152_v4, %v862_v0 }
 0x334   :  { %v166_v7 = vpop.permute.xlu1 %165 }
 0x335   :  { %v168_v8 = vadd.f32 %v166_v7, %v153_v5 }
 0x337   :  { %170 = vrot.lane.b32.xlu0 %v168_v8, %s823_s1 }
 0x33c   :  { %v227_v9 = vpop.permute.xlu1 %226 }
 0x33d   :  { %v229_v10 = vmul.f32 %v227_v9, %v862_v0 }
 0x33f   :  { %188 = vrot.lane.b32.xlu0 %v153_v5, %s828_s28  ;;  %231 = vrot.lane.b32.xlu1 %v229_v10, %s823_s1 }
 0x347   :  { %268 = vrot.lane.b32.xlu1 %v266_v12, %s823_s1 }
 0x3a9   :  { %v171_v15 = vpop.permute.xlu0 %170 }
 0x3aa   :  { %v173_v16 = vmax.f32 %v862_v0, %v171_v15 }
 0x3ac   :  { %175 = vrot.lane.b32.xlu2 %v173_v16, %s829_s29 }
 0x3b1   :  { %v232_v19 = vpop.permute.xlu1 %231  ;;  %v189_v22 = vpop.permute.xlu0 %188 }
 0x3b4   :  { %207 = vrot.lane.b32.xlu2 %v205_v18, %s825_s24  ;;  %v407_v18 = vstv %s674_s6 }
 0x3b9   :  { %v269_v25 = vpop.permute.xlu1 %268 }
 0x3ba   :  { %v271_v26 = vmul.f32 %v269_v25, %v862_v0 }
 0x3bc   :  { %v272_v28 = vadd.f32 %v271_v26, %v264_v27 }
 0x3be   :  { %v273_v47 = vsub.f32 0.0, %v272_v28  ;;  %v335_v62 = vmul.f32 %v272_v28, %v870_v6 }
 0x3c0   :  { %v274_v48 = vmul.f32 1.442695, %v273_v47 }
 0x406   :  { %v176_v20 = vpop.permute.xlu2 %175 }
 0x407   :  { %v910_v21 = vmin.f32 %v862_v0, %v176_v20 }
 0x409   :  { %v191_v23 = vsub.f32 %v910_v21, %v189_v22 }
 0x40b   :  { %v234_v24 = vadd.f32 %v232_v19, %v191_v23  ;;  %v408_v19 = vsub.f32 %v407_v18, %v862_v0 }
 0x40d   :  { %236 = vrot.lane.b32.xlu0 %v234_v24, %s830_s30 }
 0x40e   :  { %v208_v29 = vpop.permute.xlu2 %207 }
 0x40f   :  { %706 = vrcp.f32 %v208_v29  ;;  %v221_v35 = vand.u32 2147483648, %v208_v29  ;;  %vm215_vm9 = vweird.f32 %v208_v29  ;;  %v219_v36 = vand.u32 2147483647, %v208_v29 }
 0x410   :  { %708 = vpow2.f32 %v274_v48 }
 0x411   :  { %v222_v38 = vor.u32 1.1754944e-38, %v221_v35  ;;  %vm220_vm11 = vcmp.eq.f32.partialorder %v219_v36, 8.507059e+37 }
 0x415   :  { %297 = vrot.lane.b32.xlu0 %v272_v28, %s824_s23  ;;  %v707_v30 = vpop.eup %706 }
 0x416   :  { %v211_v31 = vmul.f32 %v707_v30, %v208_v29  ;;  %vm216_vm8 = vweird.f32 %v707_v30  ;;  %v709_v52 = vpop.eup %708 }
 0x417   :  { %vm217_vm10 = vmor %vm215_vm9, %vm216_vm8  ;;  %v276_v53 = vadd.f32 1.0, %v709_v52 }
 0x418   :  { %v212_v32 = vsub.f32 1.0, %v211_v31 }
 0x41a   :  { %v213_v33 = vmul.f32 %v707_v30, %v212_v32 }
 0x41c   :  { %v214_v34 = vadd.f32 %v707_v30, %v213_v33 }
 0x41e   :  { %v218_v37 = vsel %vm217_vm10, %v707_v30, %v214_v34 }
 0x41f   :  { %v223_v39 = vsel %vm220_vm11, %v222_v38, %v218_v37 }
 0x420   :  { %v224_v40 = vmul.f32 %v223_v39, %v862_v0 }
 0x47f   :  { %v237_v41 = vpop.permute.xlu0 %236 }
 0x480   :  { %v239_v42 = vadd.f32 %v237_v41, %v224_v40 }
 0x482   :  { %241 = vrot.lane.b32.xlu2 %v239_v42, %s823_s1 }
 0x487   :  { %v298_v43 = vpop.permute.xlu0 %297 }
 0x488   :  { %v300_v44 = vmul.f32 %v298_v43, %v862_v0 }
 0x48a   :  { %302 = vrot.lane.b32.xlu0 %v300_v44, %s823_s1  ;;  %259 = vrot.lane.b32.xlu2 %v224_v40, %s828_s28 }
 0x492   :  { %339 = vrot.lane.b32.xlu0 %v337_v46, %s823_s1 }
 0x4dc   :  { %v242_v50 = vpop.permute.xlu2 %241 }
 0x4dd   :  { %v244_v51 = vmax.f32 %v862_v0, %v242_v50 }
 0x4df   :  { %246 = vrot.lane.b32.xlu1 %v244_v51, %s829_s29 }
 0x4e4   :  { %v260_v57 = vpop.permute.xlu2 %259 }
 0x4e7   :  { %278 = vrot.lane.b32.xlu1 %v276_v53, %s825_s24 }
 0x4fc   :  { %v303_v54 = vpop.permute.xlu0 %302 }
 0x504   :  { %v340_v60 = vpop.permute.xlu0 %339 }
 0x505   :  { %v342_v61 = vmul.f32 %v340_v60, %v862_v0 }
 0x507   :  { %v343_v63 = vadd.f32 %v342_v61, %v335_v62 }
 0x509   :  { %v344_v20 = vsub.f32 0.0, %v343_v63  ;;  %v406_v35 = vmul.f32 %v343_v63, %v870_v6 }
 0x50b   :  { %v345_v22 = vmul.f32 1.442695, %v344_v20 }
 0x551   :  { %v247_v55 = vpop.permute.xlu1 %246 }
 0x552   :  { %v928_v56 = vmin.f32 %v862_v0, %v247_v55 }
 0x554   :  { %v262_v58 = vsub.f32 %v928_v56, %v260_v57 }
 0x556   :  { %v305_v59 = vadd.f32 %v303_v54, %v262_v58  ;;  %v478_v54 = vstv %s675_s7 }
 0x557   :  { %v479_v55 = vsub.f32 %v478_v54, %v862_v0 }
 0x558   :  { %307 = vrot.lane.b32.xlu2 %v305_v59, %s830_s30 }
 0x559   :  { %v279_v1 = vpop.permute.xlu1 %278 }
 0x55a   :  { %710 = vrcp.f32 %v279_v1  ;;  %v292_v8 = vand.u32 2147483648, %v279_v1  ;;  %vm286_vm13 = vweird.f32 %v279_v1  ;;  %v290_v9 = vand.u32 2147483647, %v279_v1 }
 0x55b   :  { %712 = vpow2.f32 %v345_v22 }
 0x55c   :  { %v293_v11 = vor.u32 1.1754944e-38, %v292_v8  ;;  %vm291_vm15 = vcmp.eq.f32.partialorder %v290_v9, 8.507059e+37 }
 0x560   :  { %368 = vrot.lane.b32.xlu2 %v343_v63, %s824_s23  ;;  %v711_v2 = vpop.eup %710 }
 0x561   :  { %v282_v3 = vmul.f32 %v711_v2, %v279_v1  ;;  %vm287_vm12 = vweird.f32 %v711_v2  ;;  %v713_v25 = vpop.eup %712 }
 0x562   :  { %vm288_vm14 = vmor %vm286_vm13, %vm287_vm12  ;;  %v347_v26 = vadd.f32 1.0, %v713_v25 }
 0x563   :  { %v283_v4 = vsub.f32 1.0, %v282_v3 }
 0x565   :  { %v284_v5 = vmul.f32 %v711_v2, %v283_v4 }
 0x567   :  { %v285_v7 = vadd.f32 %v711_v2, %v284_v5 }
 0x569   :  { %v289_v10 = vsel %vm288_vm14, %v711_v2, %v285_v7 }
 0x56a   :  { %v294_v12 = vsel %vm291_vm15, %v293_v11, %v289_v10 }
 0x56b   :  { %v295_v13 = vmul.f32 %v294_v12, %v862_v0 }
 0x5b2   :  { %v308_v14 = vpop.permute.xlu2 %307 }
 0x5b3   :  { %v310_v15 = vadd.f32 %v308_v14, %v295_v13 }
 0x5b5   :  { %312 = vrot.lane.b32.xlu1 %v310_v15, %s823_s1 }
 0x5ba   :  { %v369_v16 = vpop.permute.xlu2 %368 }
 0x5bb   :  { %v371_v17 = vmul.f32 %v369_v16, %v862_v0 }
 0x5bd   :  { %330 = vrot.lane.b32.xlu1 %v295_v13, %s828_s28  ;;  %373 = vrot.lane.b32.xlu2 %v371_v17, %s823_s1 }
 0x5c5   :  { %410 = vrot.lane.b32.xlu2 %v408_v19, %s823_s1 }
 0x617   :  { %v374_v27 = vpop.permute.xlu2 %373 }
 0x61f   :  { %v411_v33 = vpop.permute.xlu2 %410 }
 0x620   :  { %v413_v34 = vmul.f32 %v411_v33, %v862_v0 }
 0x622   :  { %v414_v36 = vadd.f32 %v413_v34, %v406_v35 }
 0x624   :  { %v415_v57 = vsub.f32 0.0, %v414_v36  ;;  %v477_v9 = vmul.f32 %v414_v36, %v870_v6 }
 0x626   :  { %v416_v58 = vmul.f32 1.442695, %v415_v57 }
 0x627   :  { %v313_v23 = vpop.permute.xlu1 %312 }
 0x628   :  { %v315_v24 = vmax.f32 %v862_v0, %v313_v23 }
 0x62a   :  { %317 = vrot.lane.b32.xlu0 %v315_v24, %s829_s29 }
 0x62f   :  { %v331_v30 = vpop.permute.xlu1 %330 }
 0x632   :  { %349 = vrot.lane.b32.xlu0 %v347_v26, %s825_s24 }
 0x69c   :  { %v318_v28 = vpop.permute.xlu0 %317 }
 0x69d   :  { %v946_v29 = vmin.f32 %v862_v0, %v318_v28  ;;  %v549_v28 = vstv %s676_s8 }
 0x69f   :  { %v333_v31 = vsub.f32 %v946_v29, %v331_v30  ;;  %v550_v30 = vsub.f32 %v549_v28, %v862_v0 }
 0x6a1   :  { %v376_v32 = vadd.f32 %v374_v27, %v333_v31 }
 0x6a3   :  { %378 = vrot.lane.b32.xlu1 %v376_v32, %s830_s30 }
 0x6a4   :  { %v350_v37 = vpop.permute.xlu0 %349 }
 0x6a5   :  { %714 = vrcp.f32 %v350_v37  ;;  %v363_v43 = vand.u32 2147483648, %v350_v37  ;;  %vm357_vm1 = vweird.f32 %v350_v37  ;;  %v361_v44 = vand.u32 2147483647, %v350_v37 }
 0x6a6   :  { %716 = vpow2.f32 %v416_v58 }
 0x6a7   :  { %v364_v46 = vor.u32 1.1754944e-38, %v363_v43  ;;  %vm362_vm3 = vcmp.eq.f32.partialorder %v361_v44, 8.507059e+37 }
 0x6ab   :  { %439 = vrot.lane.b32.xlu1 %v414_v36, %s824_s23  ;;  %v715_v38 = vpop.eup %714 }
 0x6ac   :  { %v353_v39 = vmul.f32 %v715_v38, %v350_v37  ;;  %vm358_vm0 = vweird.f32 %v715_v38  ;;  %v717_v61 = vpop.eup %716 }
 0x6ad   :  { %vm359_vm2 = vmor %vm357_vm1, %vm358_vm0  ;;  %v418_v62 = vadd.f32 1.0, %v717_v61  ;;  %vm621_vm0 = vcmask 122880   ;;  %vm627_vm1 = vcmask 0  }
 0x6ae   :  { %v354_v40 = vsub.f32 1.0, %v353_v39 }
 0x6b0   :  { %v355_v41 = vmul.f32 %v715_v38, %v354_v40 }
 0x6b2   :  { %v356_v42 = vadd.f32 %v715_v38, %v355_v41 }
 0x6b4   :  { %v360_v45 = vsel %vm359_vm2, %v715_v38, %v356_v42 }
 0x6b5   :  { %v365_v47 = vsel %vm362_vm3, %v364_v46, %v360_v45 }
 0x6b6   :  { %v366_v48 = vmul.f32 %v365_v47, %v862_v0 }
 0x715   :  { %v379_v50 = vpop.permute.xlu1 %378 }
 0x716   :  { %v381_v51 = vadd.f32 %v379_v50, %v366_v48 }
 0x718   :  { %383 = vrot.lane.b32.xlu0 %v381_v51, %s823_s1 }
 0x71d   :  { %v440_v52 = vpop.permute.xlu1 %439 }
 0x71e   :  { %v442_v53 = vmul.f32 %v440_v52, %v862_v0 }
 0x720   :  { %401 = vrot.lane.b32.xlu0 %v366_v48, %s828_s28  ;;  %444 = vrot.lane.b32.xlu1 %v442_v53, %s823_s1 }
 0x728   :  { %481 = vrot.lane.b32.xlu1 %v479_v55, %s823_s1 }
 0x78a   :  { %v384_v59 = vpop.permute.xlu0 %383 }
 0x78b   :  { %v386_v60 = vmax.f32 %v862_v0, %v384_v59 }
 0x78d   :  { %388 = vrot.lane.b32.xlu2 %v386_v60, %s829_s29 }
 0x792   :  { %v445_v63 = vpop.permute.xlu1 %444  ;;  %v402_v3 = vpop.permute.xlu0 %401 }
 0x795   :  { %420 = vrot.lane.b32.xlu2 %v418_v62, %s825_s24 }
 0x79a   :  { %v482_v7 = vpop.permute.xlu1 %481 }
 0x79b   :  { %v484_v8 = vmul.f32 %v482_v7, %v862_v0 }
 0x79d   :  { %v485_v10 = vadd.f32 %v484_v8, %v477_v9  ;;  %v831_v9 = vmov 7  }
 0x79e   :  { %695 = vset.pattern.permute.xlu1 %v831_v9  ;;  %693 = vset.pattern.permute.xlu2 %v831_v9 }
 0x79f   :  { %v486_v31 = vsub.f32 0.0, %v485_v10  ;;  %v548_v45 = vmul.f32 %v485_v10, %v870_v6  ;;  %694 = vset.pattern.permute.xlu0 %v831_v9 }
 0x7a1   :  { %v487_v32 = vmul.f32 1.442695, %v486_v31 }
 0x7e7   :  { %v389_v1 = vpop.permute.xlu2 %388 }
 0x7e8   :  { %v964_v2 = vmin.f32 %v862_v0, %v389_v1 }
 0x7ea   :  { %v404_v4 = vsub.f32 %v964_v2, %v402_v3 }
 0x7ec   :  { %v447_v5 = vadd.f32 %v445_v63, %v404_v4 }
 0x7ee   :  { %449 = vrot.lane.b32.xlu0 %v447_v5, %s830_s30 }
 0x7ef   :  { %v421_v11 = vpop.permute.xlu2 %420 }
 0x7f0   :  { %718 = vrcp.f32 %v421_v11  ;;  %v434_v17 = vand.u32 2147483648, %v421_v11  ;;  %vm428_vm5 = vweird.f32 %v421_v11  ;;  %v432_v18 = vand.u32 2147483647, %v421_v11 }
 0x7f1   :  { %720 = vpow2.f32 %v487_v32 }
 0x7f2   :  { %v435_v20 = vor.u32 1.1754944e-38, %v434_v17  ;;  %vm433_vm7 = vcmp.eq.f32.partialorder %v432_v18, 8.507059e+37 }
 0x7f6   :  { %510 = vrot.lane.b32.xlu0 %v485_v10, %s824_s23  ;;  %v719_v12 = vpop.eup %718 }
 0x7f7   :  { %v424_v13 = vmul.f32 %v719_v12, %v421_v11  ;;  %vm429_vm4 = vweird.f32 %v719_v12  ;;  %v721_v35 = vpop.eup %720 }
 0x7f8   :  { %vm430_vm6 = vmor %vm428_vm5, %vm429_vm4  ;;  %v489_v36 = vadd.f32 1.0, %v721_v35 }
 0x7f9   :  { %v425_v14 = vsub.f32 1.0, %v424_v13 }
 0x7fb   :  { %v426_v15 = vmul.f32 %v719_v12, %v425_v14 }
 0x7fd   :  { %v427_v16 = vadd.f32 %v719_v12, %v426_v15 }
 0x7ff   :  { %v431_v19 = vsel %vm430_vm6, %v719_v12, %v427_v16 }
 0x800   :  { %v436_v22 = vsel %vm433_vm7, %v435_v20, %v431_v19 }
 0x801   :  { %v437_v23 = vmul.f32 %v436_v22, %v862_v0 }
 0x860   :  { %v450_v24 = vpop.permute.xlu0 %449 }
 0x861   :  { %v452_v25 = vadd.f32 %v450_v24, %v437_v23 }
 0x863   :  { %454 = vrot.lane.b32.xlu2 %v452_v25, %s823_s1 }
 0x868   :  { %v511_v26 = vpop.permute.xlu0 %510 }
 0x869   :  { %v513_v27 = vmul.f32 %v511_v26, %v862_v0 }
 0x86b   :  { %515 = vrot.lane.b32.xlu0 %v513_v27, %s823_s1  ;;  %472 = vrot.lane.b32.xlu2 %v437_v23, %s828_s28 }
 0x873   :  { %552 = vrot.lane.b32.xlu0 %v550_v30, %s823_s1 }
 0x8bd   :  { %v455_v33 = vpop.permute.xlu2 %454 }
 0x8be   :  { %v457_v34 = vmax.f32 %v862_v0, %v455_v33  ;;  %v620_v33 = vld [vmem:[#allocation6] sm:$0x1] }
 0x8bf   :  { %622 = vst.msk [vmem:[#allocation8] sm:$0x1] %vm621_vm0, %v620_v33 }
 0x8c0   :  { %459 = vrot.lane.b32.xlu1 %v457_v34, %s829_s29 }
 0x8c5   :  { %v473_v40 = vpop.permute.xlu2 %472 }
 0x8c8   :  { %491 = vrot.lane.b32.xlu1 %v489_v36, %s825_s24 }
 0x8dd   :  { %v516_v37 = vpop.permute.xlu0 %515 }
 0x8e5   :  { %v553_v43 = vpop.permute.xlu0 %552 }
 0x8e6   :  { %v555_v44 = vmul.f32 %v553_v43, %v862_v0 }
 0x8e8   :  { %v988_v46 = vadd.f32 %v555_v44, %v548_v45 }
 0x8ea   :  { %v557_v1 = vsub.f32 0.0, %v988_v46  ;;  %v623_v32 = vperm.slane %v988_v46, 0 }
 0x8ec   :  { %v558_v3 = vmul.f32 1.442695, %v557_v1 }
 0x932   :  { %v460_v38 = vpop.permute.xlu1 %459 }
 0x933   :  { %v982_v39 = vmin.f32 %v862_v0, %v460_v38  ;;  %v43_v38 = vlaneseq }
 0x935   :  { %v475_v41 = vsub.f32 %v982_v39, %v473_v40 }
 0x937   :  { %v518_v42 = vadd.f32 %v516_v37, %v475_v41  ;;  %v44_v41 = vand.u32 127, %v43_v38 }
 0x939   :  { %520 = vrot.lane.b32.xlu2 %v518_v42, %s830_s30  ;;  %vm108_vm2 = vcmp.eq.s32.totalorder %v44_v41, 0  ;;  %vm179_vm3 = vcmp.eq.s32.totalorder %v44_v41, 1  ;;  %vm250_vm4 = vcmp.eq.s32.totalorder %v44_v41, 2  ;;  %vm321_vm5 = vcmp.eq.s32.totalorder %v44_v41, 3 }
 0x93a   :  { %v492_v47 = vpop.permute.xlu1 %491  ;;  %vm392_vm6 = vcmp.eq.s32.totalorder %v44_v41, 4  ;;  %vm463_vm7 = vcmp.eq.s32.totalorder %v44_v41, 5 }
 0x93b   :  { %722 = vrcp.f32 %v492_v47  ;;  %v505_v54 = vand.u32 2147483648, %v492_v47  ;;  %vm499_vm9 = vweird.f32 %v492_v47  ;;  %v503_v55 = vand.u32 2147483647, %v492_v47 }
 0x93c   :  { %724 = vpow2.f32 %v558_v3 }
 0x93d   :  { %v506_v58 = vor.u32 1.1754944e-38, %v505_v54  ;;  %vm504_vm11 = vcmp.eq.f32.partialorder %v503_v55, 8.507059e+37 }
 0x941   :  { %581 = vrot.lane.b32.xlu2 %v988_v46, %s824_s23  ;;  %v723_v48 = vpop.eup %722 }
 0x942   :  { %v495_v50 = vmul.f32 %v723_v48, %v492_v47  ;;  %vm500_vm8 = vweird.f32 %v723_v48  ;;  %v725_v7 = vpop.eup %724 }
 0x943   :  { %vm501_vm10 = vmor %vm499_vm9, %vm500_vm8  ;;  %v560_v8 = vadd.f32 1.0, %v725_v7  ;;  %vm534_vm8 = vcmp.eq.s32.totalorder %v44_v41, 6  ;;  %vm605_vm9 = vcmp.eq.s32.totalorder %v44_v41, 7 }
 0x944   :  { %v496_v51 = vsub.f32 1.0, %v495_v50 }
 0x946   :  { %v497_v52 = vmul.f32 %v723_v48, %v496_v51 }
 0x948   :  { %v498_v53 = vadd.f32 %v723_v48, %v497_v52 }
 0x94a   :  { %v502_v57 = vsel %vm501_vm10, %v723_v48, %v498_v53  ;;  %vm618_vm10 = vcmask 57344  }
 0x94b   :  { %v507_v6 = vsel %vm504_vm11, %v506_v58, %v502_v57  ;;  %vm634_vm11 = vcmask 8200  }
 0x94c   :  { %v508_v59 = vmul.f32 %v507_v6, %v862_v0 }
 0x993   :  { %v521_v60 = vpop.permute.xlu2 %520 }
 0x994   :  { %v523_v61 = vadd.f32 %v521_v60, %v508_v59 }
 0x996   :  { %525 = vrot.lane.b32.xlu1 %v523_v61, %s823_s1 }
 0x99b   :  { %v582_v62 = vpop.permute.xlu2 %581 }
 0x99c   :  { %v584_v63 = vmul.f32 %v582_v62, %v862_v0 }
 0x99e   :  { %543 = vrot.lane.b32.xlu1 %v508_v59, %s828_s28  ;;  %586 = vrot.lane.b32.xlu2 %v584_v63, %s823_s1 }
 0x9f8   :  { %v587_v14 = vpop.permute.xlu2 %586 }
 0xa08   :  { %v526_v4 = vpop.permute.xlu1 %525 }
 0xa09   :  { %v528_v5 = vmax.f32 %v862_v0, %v526_v4 }
 0xa0b   :  { %530 = vrot.lane.b32.xlu0 %v528_v5, %s829_s29 }
 0xa10   :  { %v544_v12 = vpop.permute.xlu1 %543 }
 0xa13   :  { %562 = vrot.lane.b32.xlu0 %v560_v8, %s825_s24 }
 0xa7d   :  { %v531_v10 = vpop.permute.xlu0 %530 }
 0xa7e   :  { %v533_v11 = vmin.f32 %v862_v0, %v531_v10 }
 0xa80   :  { %v546_v13 = vsub.f32 %v533_v11, %v544_v12 }
 0xa82   :  { %v589_v15 = vadd.f32 %v587_v14, %v546_v13 }
 0xa84   :  { %591 = vrot.lane.b32.xlu1 %v589_v15, %s830_s30 }
 0xa85   :  { %v563_v16 = vpop.permute.xlu0 %562 }
 0xa86   :  { %726 = vrcp.f32 %v563_v16  ;;  %v576_v20 = vand.u32 2147483648, %v563_v16  ;;  %v574_v23 = vand.u32 2147483647, %v563_v16  ;;  %vm570_vm13 = vweird.f32 %v563_v16 }
 0xa88   :  { %v577_v25 = vor.u32 1.1754944e-38, %v576_v20  ;;  %vm575_vm15 = vcmp.eq.f32.partialorder %v574_v23, 8.507059e+37 }
 0xa8c   :  { %v727_v17 = vpop.eup %726 }
 0xa8d   :  { %v566_v18 = vmul.f32 %v727_v17, %v563_v16  ;;  %vm571_vm12 = vweird.f32 %v727_v17 }
 0xa8e   :  { %vm572_vm14 = vmor %vm570_vm13, %vm571_vm12 }
 0xa8f   :  { %v567_v19 = vsub.f32 1.0, %v566_v18 }
 0xa91   :  { %v568_v22 = vmul.f32 %v727_v17, %v567_v19 }
 0xa93   :  { %v569_v24 = vadd.f32 %v727_v17, %v568_v22 }
 0xa95   :  { %v573_v26 = vsel %vm572_vm14, %v727_v17, %v569_v24 }
 0xa96   :  { %v578_v27 = vsel %vm575_vm15, %v577_v25, %v573_v26 }
 0xa97   :  { %v579_v28 = vmul.f32 %v578_v27, %v862_v0 }
 0xa99   :  { %614 = vrot.lane.b32.xlu1 %v579_v28, %s828_s28 }
 0xaa1   :  { %253 = vperm.xlu1 %695, %v928_v56  }
 0xaa9   :  { %395 = vperm.xlu1 %695, %v964_v2  }
 0xaf6   :  { %v592_v30 = vpop.permute.xlu1 %591 }
 0xaf7   :  { %v594_v31 = vadd.f32 %v592_v30, %v579_v28 }
 0xaf9   :  { %596 = vrot.lane.b32.xlu2 %v594_v31, %s823_s1 }
 0xb01   :  { %111 = vperm.xlu2 %693, %v892_v49  }
 0xb09   :  { %324 = vperm.xlu2 %693, %v946_v29  }
 0xb0b   :  { %v615_v36 = vpop.permute.xlu1 %614 }
 0xb11   :  { %466 = vperm.xlu2 %693, %v982_v39  }
 0xb13   :  { %v254_v37 = vpop.permute.xlu1 %253 }
 0xb14   :  { %v256_v47 = vperm.slane %v254_v37, 0 }
 0xb19   :  { %624 = vrot.lane.b32.xlu2 %v623_v32, %s832_s9 }
 0xb1b   :  { %v396_v45 = vpop.permute.xlu1 %395 }
 0xb53   :  { %v597_v56 = vpop.permute.xlu2 %596 }
 0xb54   :  { %v599_v2 = vmax.f32 %v862_v0, %v597_v56 }
 0xb56   :  { %601 = vrot.lane.b32.xlu0 %v599_v2, %s829_s29 }
 0xb5b   :  { %v112_v34 = vpop.permute.xlu2 %111 }
 0xb5c   :  { %v114_v44 = vperm.slane %v112_v34, 0 }
 0xb5e   :  { %182 = vperm.xlu0 %694, %v910_v21   ;;  %v115_v48 = vsel %vm108_vm2, %v114_v44, 0.0 }
 0xb63   :  { %v325_v49 = vpop.permute.xlu2 %324 }
 0xb64   :  { %v327_v50 = vperm.slane %v325_v49, 0 }
 0xb66   :  { %537 = vperm.xlu0 %694, %v533_v11  }
 0xb6b   :  { %v467_v29 = vpop.permute.xlu2 %466 }
 0xb6c   :  { %v469_v53 = vperm.slane %v467_v29, 0 }
 0xb73   :  { %v625_v35 = vpop.permute.xlu2 %624 }
 0xb74   :  { %628 = vst.msk [vmem:[#allocation8] sm:$0x1] %vm627_vm1, %v625_v35 }
 0xbc8   :  { %v602_v39 = vpop.permute.xlu0 %601 }
 0xbc9   :  { %v604_v40 = vmin.f32 %v862_v0, %v602_v39  ;;  %v398_v0 = vperm.slane %v396_v45, 0 }
 0xbcb   :  { %v617_v42 = vsub.f32 %v604_v40, %v615_v36  ;;  %608 = vperm.xlu1 %695, %v604_v40  }
 0xbcd   :  { %v630_v43 = vperm.slane %v617_v42, 0 }
 0xbcf   :  { %631 = vrot.lane.b32.xlu0 %v630_v43, %s833_s10 }
 0xbd0   :  { %v183_v21 = vpop.permute.xlu0 %182 }
 0xbd1   :  { %v185_v46 = vperm.slane %v183_v21, 0 }
 0xbd3   :  { %v186_v51 = vsel %vm179_vm3, %v185_v46, %v115_v48 }
 0xbd4   :  { %v257_v52 = vsel %vm250_vm4, %v256_v47, %v186_v51 }
 0xbd5   :  { %v328_v54 = vsel %vm321_vm5, %v327_v50, %v257_v52 }
 0xbd6   :  { %v399_v55 = vsel %vm392_vm6, %v398_v0, %v328_v54 }
 0xbd7   :  { %v470_v57 = vsel %vm463_vm7, %v469_v53, %v399_v55 }
 0xbd8   :  { %v538_v58 = vpop.permute.xlu0 %537 }
 0xbd9   :  { %v540_v6 = vperm.slane %v538_v58, 0 }
 0xbdb   :  { %v541_v61 = vsel %vm534_vm8, %v540_v6, %v470_v57 }
 0xc3d   :  { %v609_v59 = vpop.permute.xlu1 %608 }
 0xc3e   :  { %v611_v60 = vperm.slane %v609_v59, 0 }
 0xc40   :  { %v612_v62 = vsel %vm605_vm9, %v611_v60, %v541_v61 }
 0xc41   :  { %v632_v63 = vpop.permute.xlu0 %631  ;;  %619 = vst.msk [vmem:[#allocation7] sm:$0x1] %vm618_vm10, %v612_v62 }
 0xc42   :  { %646 = dma.vmem_to_hbm [thread:$0]  %s642_s12, 16, %s644_s15, [#allocation4]   ;;  %635 = vst.msk [vmem:[#allocation8] sm:$0x1] %vm634_vm11, %v632_v63 }
 0xc43   :  { %657 = dma.vmem_to_hbm [thread:$0]  %s653_s17, 16, %s655_s20, [#allocation9]  }
 0xc44   :  { %816 = dma.done.wait [#allocation4], 16  }
 0xc45   :  { %817 = vsyncadd [#allocation4], 4294967280 }
 0xc46   :  { %818 = dma.done.wait [#allocation9], 16  }
 0xc47   :  { %819 = vsyncadd [#allocation9], 4294967280 }
 0xc48   :  { %666 = vsyncpa [#allocation3], 1 }
 0xc49   :  { %667 = vsyncpa [#allocation4], 1 }
 0xc4a   :  { %668 = vsyncpa [#allocation9], 1 }
 0xc4b   :  { %669 = vsyncpa [#allocation5], 1 }

</bundles_post_ra>
